<compile_context>
chip_gen: v6e
topology: v6e:2x2x1
jax: 0.10.0
libtpu: 0.0.40
codegen_flags: <defaults>
</compile_context>

<pallas_src>
import jax
import jax.numpy as jnp
from jax.experimental import pallas as pl
from jax.experimental.pallas import tpu as pltpu

LANE = 128      # vreg lane width: pad last dims to this for unmasked stores
SUBLANE = 8     # f32 sublane multiple for second-minor block dims


def _round_up(x, m):
    return (x + m - 1) // m * m


def _pad_axis(a, axis, target):
    pad = target - a.shape[axis]
    if pad == 0:
        return a
    widths = [(0, 0)] * a.ndim
    widths[axis] = (0, pad)
    return jnp.pad(a, widths)


# ----------------------------------------------------------------------------
# Fused Pallas kernel: patch-embedding projection + classifier head.
# Grid = (batch b, patch-tile m).
#   every step :  emb[b, m] = f32( bf16(flat) @ bf16(w_patch) ) + (pos+bias)   (MXU + f32 VPU)
#   last step  :  logits    = f32( bf16(cls_feats) @ bf16(w_cls) ) + b_cls     (fused head)
# logits' out block has a constant index -> stays resident in VMEM for the whole
# grid and is written back once at the end (canonical finalize pattern).
# ----------------------------------------------------------------------------
def _net_fused_kernel(flat_ref, w_patch_ref, posb_ref,
                      cls_ref, w_cls_ref, b_cls_ref,
                      emb_ref, logits_ref):
    acc = jnp.dot(flat_ref[...], w_patch_ref[...],
                  preferred_element_type=jnp.float32)        # bf16 x bf16 -> f32 acc
    emb_ref[...] = acc + posb_ref[...]                       # pos + bias epilogue (f32)

    is_last = jnp.logical_and(pl.program_id(0) == pl.num_programs(0) - 1,
                              pl.program_id(1) == pl.num_programs(1) - 1)

    @pl.when(is_last)
    def _():
        logits_ref[...] = (jnp.dot(cls_ref[...], w_cls_ref[...],
                                   preferred_element_type=jnp.float32)
                           + b_cls_ref[...])


def run_net_kernel(flat_bf16, cls_feats_bf16, params):
    """One pallas_call producing (patch embeddings [B,Np_pad,Dp] f32, logits [B,Lp] f32)."""
    B, Np_pad, K = flat_bf16.shape
    Dp = params["w_patch_bf"].shape[1]
    Lp = params["w_cls_bf"].shape[1]
    tm = min(256, Np_pad)                      # cap keeps double-buffered tiles tiny vs VMEM
    assert Np_pad % tm == 0 and tm % SUBLANE == 0
    assert Dp % LANE == 0 and Lp % LANE == 0 and K % LANE == 0
    grid = (B, Np_pad // tm)
    vmem = pltpu.MemorySpace.VMEM

    cost = pl.CostEstimate(
        flops=2 * B * Np_pad * K * Dp + 2 * B * Dp * Lp,
        transcendentals=0,
        bytes_accessed=(2 * B * Np_pad * K            # flat (bf16)
                        + 2 * K * Dp                  # w_patch (bf16)
                        + 4 * Np_pad * Dp             # pos+bias table (f32)
                        + 2 * B * Dp + 2 * Dp * Lp    # cls feats + w_cls (bf16)
                        + 4 * Lp                      # b_cls (f32)
                        + 4 * B * Np_pad * Dp         # emb out (f32)
                        + 4 * B * Lp),                # logits out (f32)
    )

    emb, logits = pl.pallas_call(
        _net_fused_kernel,
        out_shape=(jax.ShapeDtypeStruct((B, Np_pad, Dp), jnp.float32),
                   jax.ShapeDtypeStruct((B, Lp), jnp.float32)),
        grid=grid,
        in_specs=[
            pl.BlockSpec((None, tm, K), lambda b, m: (b, m, 0), memory_space=vmem),
            pl.BlockSpec((K, Dp), lambda b, m: (0, 0), memory_space=vmem),
            pl.BlockSpec((tm, Dp), lambda b, m: (m, 0), memory_space=vmem),  # pos+bias, no B-dup
            pl.BlockSpec((B, Dp), lambda b, m: (0, 0), memory_space=vmem),
            pl.BlockSpec((Dp, Lp), lambda b, m: (0, 0), memory_space=vmem),
            pl.BlockSpec((1, Lp), lambda b, m: (0, 0), memory_space=vmem),
        ],
        out_specs=(
            pl.BlockSpec((None, tm, Dp), lambda b, m: (b, m, 0), memory_space=vmem),
            pl.BlockSpec((B, Lp), lambda b, m: (0, 0), memory_space=vmem),
        ),
        compiler_params=pltpu.CompilerParams(
            # logits out block has a constant index across both axes (written once,
            # resident for the whole grid), so neither axis may be marked "parallel".
            dimension_semantics=("arbitrary", "arbitrary")),
        cost_estimate=cost,
    )(flat_bf16, params["w_patch_bf"], params["posb_f32"],
      cls_feats_bf16, params["w_cls_bf"], params["b_cls_f32"])
    return emb, logits


# ----------------------------------------------------------------------------
# XLA-side layout plumbing (patch extraction + padding), emitted directly in bf16
# ----------------------------------------------------------------------------
def _patchify(x, patch, K_pad, Np_pad):
    B, C, H, W = x.shape
    nh, nw = H // patch, W // patch
    xp = x.reshape(B, C, nh, patch, nw, patch).transpose(0, 2, 4, 1, 3, 5)
    flat = xp.reshape(B, nh * nw, C * patch * patch)
    flat = _pad_axis(_pad_axis(flat, 1, Np_pad), 2, K_pad)
    return flat.astype(jnp.bfloat16)


# ----------------------------------------------------------------------------
# Full Net forward:  classifier(feature_extractor(x).last_hidden_state[:, 0, :])
# (single fused pallas_call; logits sliced back to num_labels)
# ----------------------------------------------------------------------------
def net_forward(x, params, *, patch, num_labels):
    B = x.shape[0]
    Np_pad, Dp = params["posb_f32"].shape
    K_pad = params["w_patch_bf"].shape[0]
    flat_bf16 = _patchify(x, patch, K_pad, Np_pad)
    cls_feats_bf16 = jnp.broadcast_to(params["cls_feat_bf"], (B, Dp))   # CLS row of lhs
    _, logits_p = run_net_kernel(flat_bf16, cls_feats_bf16, params)
    return logits_p[:, :num_labels]


# Test/inspection helper only: assemble the full last_hidden_state [B, 1+N, Dp].
def feature_extractor(x, params, *, patch):
    B, C, H, W = x.shape
    n_patches = (H // patch) * (W // patch)
    Np_pad, Dp = params["posb_f32"].shape
    K_pad = params["w_patch_bf"].shape[0]
    flat_bf16 = _patchify(x, patch, K_pad, Np_pad)
    cls_feats_bf16 = jnp.broadcast_to(params["cls_feat_bf"], (B, Dp))
    emb, _ = run_net_kernel(flat_bf16, cls_feats_bf16, params)
    cls_row = jnp.broadcast_to(params["cls_feat_f32"][None, :, :], (B, 1, Dp))
    # concat exists only on this test path; the logits path never materializes [B, S, Dp]
    return jnp.concatenate([cls_row, emb[:, :n_patches, :]], axis=1)


# ----------------------------------------------------------------------------
# Parameters
# ----------------------------------------------------------------------------
def init_params(key, *, in_channels, patch, image_hw, hidden, num_labels):
    H, W = image_hw
    n_patches = (H // patch) * (W // patch)
    patch_dim = in_channels * patch * patch
    k1, k2, k3, k4, k5, k6 = jax.random.split(key, 6)
    bp = 1.0 / jnp.sqrt(patch_dim)                   # PyTorch-style Linear init
    bc = 1.0 / jnp.sqrt(hidden)
    return {
        "w_patch": jax.random.uniform(k1, (patch_dim, hidden), jnp.float32, -bp, bp),
        "b_patch": jax.random.uniform(k2, (hidden,), jnp.float32, -bp, bp),
        "cls_token": jax.random.normal(k3, (1, hidden), jnp.float32) * 0.02,
        "pos_embed": jax.random.normal(k4, (1 + n_patches, hidden), jnp.float32) * 0.02,
        "w_cls": jax.random.uniform(k5, (hidden, num_labels), jnp.float32, -bc, bc),
        "b_cls": jax.random.uniform(k6, (num_labels,), jnp.float32, -bc, bc),
    }


def prep_params(raw, *, hidden, num_labels):
    """One-time prep: lane-pad to 128, store MXU operands in bf16, fold bias into pos."""
    Dp = _round_up(hidden, LANE)
    Lp = _round_up(num_labels, LANE)
    K = raw["w_patch"].shape[0]
    K_pad = _round_up(K, LANE)
    n_patches = raw["pos_embed"].shape[0] - 1
    tm = min(256, _round_up(n_patches, SUBLANE))
    Np_pad = _round_up(n_patches, tm)

    w_patch_p = _pad_axis(_pad_axis(raw["w_patch"], 0, K_pad), 1, Dp)       # [Kp, Dp]
    posb = raw["pos_embed"][1:, :] + raw["b_patch"][None, :]                # bias folded in
    posb_p = _pad_axis(_pad_axis(posb, 0, Np_pad), 1, Dp)                   # [Np_pad, Dp] f32
    cls_feat = raw["cls_token"] + raw["pos_embed"][0:1, :]                  # CLS row of lhs
    cls_feat_p = _pad_axis(cls_feat, 1, Dp)                                 # [1, Dp]
    w_cls_p = _pad_axis(_pad_axis(raw["w_cls"], 0, Dp), 1, Lp)              # [Dp, Lp]
    b_cls_p = _pad_axis(raw["b_cls"], 0, Lp)[None, :]                       # [1, Lp]

    return {
        "w_patch_bf": w_patch_p.astype(jnp.bfloat16),
        "posb_f32": posb_p,
        "cls_feat_f32": cls_feat_p,
        "cls_feat_bf": cls_feat_p.astype(jnp.bfloat16),
        "w_cls_bf": w_cls_p.astype(jnp.bfloat16),
        "b_cls_f32": b_cls_p,
    }


if __name__ == "__main__":
    B, C, H, W = 2, 4, 16, 16
    PATCH = 8
    HIDDEN = 32        # inp_size of the classifier (lane-padded to 128 inside the kernel)
    NUM_LABELS = 5     # lane-padded to 128 in the kernel output, sliced back

    key = jax.random.PRNGKey(0)
    kx, kp = jax.random.split(key)
    x = jax.random.normal(kx, (B, C, H, W), jnp.float32)   # NCHW, like PyTorch
    raw = init_params(kp, in_channels=C, patch=PATCH, image_hw=(H, W),
                      hidden=HIDDEN, num_labels=NUM_LABELS)
    params = prep_params(raw, hidden=HIDDEN, num_labels=NUM_LABELS)

    out = net_forward(x, params, patch=PATCH, num_labels=NUM_LABELS)
    out = jax.block_until_ready(out)

    # ---- Pure-JAX reference (same bf16 operand rounding, f32 accumulation) ----
    def _bf(a):
        return a.astype(jnp.bfloat16)

    nh, nw = H // PATCH, W // PATCH
    xp = x.reshape(B, C, nh, PATCH, nw, PATCH).transpose(0, 2, 4, 1, 3, 5)
    flat = xp.reshape(B, nh * nw, C * PATCH * PATCH)
    emb_ref = jnp.einsum("bnk,kd->bnd", _bf(flat), _bf(raw["w_patch"]),
                         preferred_element_type=jnp.float32) + raw["b_patch"]
    toks = jnp.concatenate(
        [jnp.broadcast_to(raw["cls_token"], (B, 1, HIDDEN)), emb_ref], axis=1)
    lhs_ref = toks + raw["pos_embed"][None]
    logits_ref = jnp.dot(_bf(lhs_ref[:, 0, :]), _bf(raw["w_cls"]),
                         preferred_element_type=jnp.float32) + raw["b_cls"]

    # Check both: the extractor's last_hidden_state and the final logits.
    lhs_pallas = feature_extractor(x, params, patch=PATCH)
    lhs_pallas = jax.block_until_ready(lhs_pallas)
    assert out.shape == (B, NUM_LABELS)
    assert jnp.allclose(lhs_pallas[..., :HIDDEN], lhs_ref, atol=1e-3, rtol=1e-3)
    assert jnp.allclose(out, logits_ref, atol=1e-3, rtol=1e-3)

    print("KERNEL_OK")
</pallas_src>

<mosaic_0001>
module attributes {stable_mosaic.version = 11 : i64} {
  func.func @_net_fused_kernel(%arg0: i32, %arg1: i32, %arg2: memref<1x8x256xbf16, #tpu.memory_space<vmem>>, %arg3: memref<256x128xbf16, #tpu.memory_space<vmem>>, %arg4: memref<8x128xf32, #tpu.memory_space<vmem>>, %arg5: memref<2x128xbf16, #tpu.memory_space<vmem>>, %arg6: memref<128x128xbf16, #tpu.memory_space<vmem>>, %arg7: memref<1x128xf32, #tpu.memory_space<vmem>>, %arg8: memref<1x8x128xf32, #tpu.memory_space<vmem>>, %arg9: memref<2x128xf32, #tpu.memory_space<vmem>>) attributes {dimension_semantics = [#tpu.dimension_semantics<arbitrary>, #tpu.dimension_semantics<arbitrary>], iteration_bounds = array<i64: 2, 1>, scalar_prefetch = 0 : i64, scratch_operands = 0 : i64, tpu.core_type = #tpu.core_type<tc>, window_params = [{transform_indices = @transform_0, window_bounds = array<i64: 1, 8, 256>}, {pipeline_mode = #tpu.pipeline_mode<synchronous>, transform_indices = @transform_1, window_bounds = array<i64: 256, 128>}, {transform_indices = @transform_2, window_bounds = array<i64: 8, 128>}, {pipeline_mode = #tpu.pipeline_mode<synchronous>, transform_indices = @transform_3, window_bounds = array<i64: 2, 128>}, {pipeline_mode = #tpu.pipeline_mode<synchronous>, transform_indices = @transform_4, window_bounds = array<i64: 128, 128>}, {pipeline_mode = #tpu.pipeline_mode<synchronous>, transform_indices = @transform_5, window_bounds = array<i64: 1, 128>}, {transform_indices = @transform_6, window_bounds = array<i64: 1, 8, 128>}, {pipeline_mode = #tpu.pipeline_mode<synchronous>, transform_indices = @transform_7, window_bounds = array<i64: 2, 128>}]} {
    %c0 = arith.constant 0 : index
    %c0_0 = arith.constant 0 : index
    %c0_1 = arith.constant 0 : index
    %0 = vector.load %arg2[%c0, %c0_0, %c0_1] : memref<1x8x256xbf16, #tpu.memory_space<vmem>>, vector<1x8x256xbf16>
    %1 = vector.shape_cast %0 : vector<1x8x256xbf16> to vector<8x256xbf16>
    %c0_2 = arith.constant 0 : index
    %c0_3 = arith.constant 0 : index
    %2 = vector.load %arg3[%c0_2, %c0_3] : memref<256x128xbf16, #tpu.memory_space<vmem>>, vector<256x128xbf16>
    %cst = arith.constant dense<0.000000e+00> : vector<8x128xf32>
    %3 = tpu.matmul %1, %2, %cst {dimension_numbers = #tpu.dot_dimension_numbers<[1], [0], [0], [1], [0, 0, 1, 1], [], []>} : vector<8x256xbf16>, vector<256x128xbf16>, vector<8x128xf32> -> vector<8x128xf32>
    %c0_4 = arith.constant 0 : index
    %c0_5 = arith.constant 0 : index
    %4 = vector.load %arg4[%c0_4, %c0_5] : memref<8x128xf32, #tpu.memory_space<vmem>>, vector<8x128xf32>
    %5 = arith.addf %3, %4 : vector<8x128xf32>
    %c0_6 = arith.constant 0 : index
    %c0_7 = arith.constant 0 : index
    %c0_8 = arith.constant 0 : index
    %6 = vector.load %arg8[%c0_6, %c0_7, %c0_8] : memref<1x8x128xf32, #tpu.memory_space<vmem>>, vector<1x8x128xf32>
    %7 = vector.shape_cast %6 : vector<1x8x128xf32> to vector<8x128xf32>
    %8 = vector.shape_cast %5 : vector<8x128xf32> to vector<1x8x128xf32>
    tpu.vector_store %arg8[%c0_6, %c0_7, %c0_8], %8 {strides = array<i32>} : memref<1x8x128xf32, #tpu.memory_space<vmem>>, vector<1x8x128xf32>,
    %c1_i32 = arith.constant 1 : i32
    %9 = arith.cmpi eq, %arg0, %c1_i32 : i32
    %c0_i32 = arith.constant 0 : i32
    %10 = arith.cmpi eq, %arg1, %c0_i32 : i32
    %11 = arith.andi %9, %10 : i1
    %12 = arith.extui %11 : i1 to i32
    %c0_i32_9 = arith.constant 0 : i32
    %13 = arith.cmpi ne, %12, %c0_i32_9 : i32
    scf.if %13 {
      %c0_10 = arith.constant 0 : index
      %c0_11 = arith.constant 0 : index
      %14 = vector.load %arg5[%c0_10, %c0_11] : memref<2x128xbf16, #tpu.memory_space<vmem>>, vector<2x128xbf16>
      %c0_12 = arith.constant 0 : index
      %c0_13 = arith.constant 0 : index
      %15 = vector.load %arg6[%c0_12, %c0_13] : memref<128x128xbf16, #tpu.memory_space<vmem>>, vector<128x128xbf16>
      %cst_14 = arith.constant dense<0.000000e+00> : vector<2x128xf32>
      %16 = tpu.matmul %14, %15, %cst_14 {dimension_numbers = #tpu.dot_dimension_numbers<[1], [0], [0], [1], [0, 0, 1, 1], [], []>} : vector<2x128xbf16>, vector<128x128xbf16>, vector<2x128xf32> -> vector<2x128xf32>
      %c0_15 = arith.constant 0 : index
      %c0_16 = arith.constant 0 : index
      %17 = vector.load %arg7[%c0_15, %c0_16] : memref<1x128xf32, #tpu.memory_space<vmem>>, vector<1x128xf32>
      %18 = vector.broadcast %17 : vector<1x128xf32> to vector<2x128xf32>
      %19 = arith.addf %16, %18 : vector<2x128xf32>
      %c0_17 = arith.constant 0 : index
      %c0_18 = arith.constant 0 : index
      %20 = vector.load %arg9[%c0_17, %c0_18] : memref<2x128xf32, #tpu.memory_space<vmem>>, vector<2x128xf32>
      tpu.vector_store %arg9[%c0_17, %c0_18], %19 {strides = array<i32>} : memref<2x128xf32, #tpu.memory_space<vmem>>, vector<2x128xf32>,
    } else {
    }
    return
  }
  func.func @transform_0(%arg0: i32, %arg1: i32) -> (i32, i32, i32) {
    %c0_i32 = arith.constant 0 : i32
    %c0_i32_0 = arith.constant 0 : i32
    return %arg0, %arg1, %c0_i32 : i32, i32, i32
  }
  func.func @transform_1(%arg0: i32, %arg1: i32) -> (i32, i32) {
    %c0_i32 = arith.constant 0 : i32
    %c0_i32_0 = arith.constant 0 : i32
    %c0_i32_1 = arith.constant 0 : i32
    return %c0_i32, %c0_i32_0 : i32, i32
  }
  func.func @transform_2(%arg0: i32, %arg1: i32) -> (i32, i32) {
    %c0_i32 = arith.constant 0 : i32
    %c0_i32_0 = arith.constant 0 : i32
    return %arg1, %c0_i32 : i32, i32
  }
  func.func @transform_3(%arg0: i32, %arg1: i32) -> (i32, i32) {
    %c0_i32 = arith.constant 0 : i32
    %c0_i32_0 = arith.constant 0 : i32
    %c0_i32_1 = arith.constant 0 : i32
    return %c0_i32, %c0_i32_0 : i32, i32
  }
  func.func @transform_4(%arg0: i32, %arg1: i32) -> (i32, i32) {
    %c0_i32 = arith.constant 0 : i32
    %c0_i32_0 = arith.constant 0 : i32
    %c0_i32_1 = arith.constant 0 : i32
    return %c0_i32, %c0_i32_0 : i32, i32
  }
  func.func @transform_5(%arg0: i32, %arg1: i32) -> (i32, i32) {
    %c0_i32 = arith.constant 0 : i32
    %c0_i32_0 = arith.constant 0 : i32
    %c0_i32_1 = arith.constant 0 : i32
    return %c0_i32, %c0_i32_0 : i32, i32
  }
  func.func @transform_6(%arg0: i32, %arg1: i32) -> (i32, i32, i32) {
    %c0_i32 = arith.constant 0 : i32
    %c0_i32_0 = arith.constant 0 : i32
    return %arg0, %arg1, %c0_i32 : i32, i32, i32
  }
  func.func @transform_7(%arg0: i32, %arg1: i32) -> (i32, i32) {
    %c0_i32 = arith.constant 0 : i32
    %c0_i32_0 = arith.constant 0 : i32
    %c0_i32_1 = arith.constant 0 : i32
    return %c0_i32, %c0_i32_0 : i32, i32
  }
}

</mosaic_0001>

<bundles_post_ra>
// kernel: tpu_custom_call.1
= control target key start
LH: loop header
LB: loop body
LE: loop exit
PB: predicated region body
PF: predicated region fallthrough
CT: control target
= control target key end

     0   :  { %s1528_s0 = inlined_call_operand.hbm [shape: bf16[2,8,256], index: 0, kind: input, shape index: {}]   ;;  %s1529_s1 = inlined_call_operand.hbm [shape: bf16[256,128], index: 1, kind: input, shape index: {}]   ;;  %s1530_s2 = inlined_call_operand.hbm [shape: f32[8,128], index: 2, kind: input, shape index: {}]   ;;  %s1531_s3 = inlined_call_operand.vmem [shape: bf16[2,128], index: 3, kind: input, shape index: {}]   ;;  %s1532_s4 = inlined_call_operand.hbm [shape: bf16[128,128], index: 4, kind: input, shape index: {}]   ;;  %s1533_s5 = inlined_call_operand.vmem [shape: f32[1,128], index: 5, kind: input, shape index: {}]   ;;  %s1534_s6 = inlined_call_operand.hbm [shape: f32[2,8,128], index: 6, kind: output, shape index: {0}]   ;;  %s1535_s7 = inlined_call_operand.hbm [shape: f32[2,128], index: 7, kind: output, shape index: {1}]  }
   0x1   :  { %1541 = sst [smem:[#allocation19_spill]] %s1529_s1 }
   0x2   :  { %1542 = sst [smem:[#allocation20_spill]] %s1530_s2 }
   0x3   :  { %1543 = sst [smem:[#allocation21_spill]] %s1532_s4 }
   0x4   :  { %13 = vsyncpa [#allocation3], 0 }
   0x5   :  { %15 = vsyncpa [#allocation3 + $0x1], 0 }
   0x6   :  { %16 = vsyncpa [#allocation6], 0 }
   0x7   :  { %17 = vsyncpa [#allocation9], 0 }
   0x8   :  { %18 = vsyncpa [#allocation4], 0 }
   0x9   :  { %20 = vsyncpa [#allocation4 + $0x1], 0 }
   0xa   :  { %21 = vsyncpa [#allocation12], 0  ;;  %s1316_s24 = smov 0   ;;  %s1318_s25 = smov 0  }
   0xb   :  { %s1320_s26 = smov 0   ;;  %s1322_s27 = smov 0  }
   0xc   :  { %s1324_s28 = smov 0   ;;  %s1326_s29 = smov 0  }
   0xd LB: > { %s809_s30 = sadd.s32 4294967295, %s1264_s29   ;;  %s810_s8 = sadd.s32 4294967294, %s1264_s29   ;;  %s1264_s29 = sphi %s1326_s29, %s27_s29   ;;  %s1260_s28 = sphi %s1324_s28, %s1566_s28   ;;  %s1256_s27 = sphi %s1322_s27, %s1565_s27   ;;  %s1252_s26 = sphi %s1320_s26, %s1564_s26   ;;  %s1248_s25 = sphi %s1318_s25, %s1563_s25   ;;  %s1244_s24 = sphi %s1316_s24, %s1562_s24  }
   0xe   : > { %p61_p0 = scmp.ne.s32.totalorder %s1248_s25, %s1244_s24  ;;  %p1350_p1 = scmp.eq.s32.totalorder %s809_s30, 0 }
   0xf   : > { %p1354_p2 = scmp.eq.s32.totalorder %s809_s30, 1  ;;  %p203_p3 = scmp.eq.s32.totalorder %s810_s8, 1 }
  0x10   : > { %s1544_s9 = scalar_select %p1350_p1, 1, 0 }
  0x11   : > { %p1360_p4 = por %p1350_p1, %p61_p0  ;;  %p811_p5 = scmp.ge.s32.totalorder %s1264_s29, 1 }
  0x12   : > { %p1365_p6 = por %p203_p3, %p61_p0  ;;  %p231_p7 = scmp.lt.s32.totalorder %s1264_s29, 3 }
  0x13   : > { %s1546_s11 = scalar_select %p1360_p4, 1, 0 }
  0x14   : > { %s1547_s12 = scalar_select %p1365_p6, 1, 0 }
  0x15   : > { %p1370_p8 = pnand %p811_p5, %p231_p7  ;;  %s1266_s14 = smov [#allocation5]  }
  0x16   : > { %s243_s15 = sshll.u32 %s1266_s14, 4  ;;  %s1267_s17 = smov [#allocation7]   ;;  %s244_s15 = int_to_ptr.vmem [resolvable:$true] %s243_s15 }
  0x17   : > { %s1548_s13 = scalar_select %p1370_p8, 1, 0 }
  0x18   : > { %p932_p9 = pneg %p1370_p8  ;;  %s259_s18 = sshll.u32 %s1267_s17, 4  ;;  %s260_s18 = int_to_ptr.vmem [resolvable:$true] %s259_s18 }
  0x19   : > { %s1268_s19 = smov [#allocation8]   ;;  %s1053_s21 = scalar_lea.vmem %s244_s15, 2048 }
  0x1a   : > { %p1379_p11 = pnand %p932_p9, %p1350_p1  ;;  %s272_s20 = sshll.u32 %s1268_s19, 4  ;;  %s273_s20 = int_to_ptr.vmem [resolvable:$true] %s272_s20 }
  0x1b   : > { %p1054_p13 = scmp.ne.s32.totalorder %s244_s15, %s1053_s21  ;;  %p1061_p5 = scmp.lt.s32.totalorder %s244_s15, %s244_s15 }
  0x1c   : > { %p1044_p12 = pneg %p1379_p11  ;;  %p1062_p7 = scmp.lt.s32.totalorder %s1053_s21, %s1053_s21 }
  0x1e   : > { %p1056_p0 = pnand %p1054_p13, %p1044_p12  ;;  %p1063_p9 = por %p1062_p7, %p1061_p5 }
  0x20   : > { %p1057_p3 = pneg %p1056_p0 }
  0x22   : > { %p1064_p10 = pnand %p1063_p9, %p1057_p3 }
  0x24   : > { %1067 = shalt.err (!%p1064_p10)
}
  0x25   : > { %s1269_s22 = smov 64   ;;  %s1270_s23 = smov 4  }
  0x26   : > { %s1550_s1 = sld [smem:[#allocation19_spill]]  ;;  %s1079_s14 = scalar_lea.vmem %s260_s18, 128 }
  0x27   : > { %p1080_p6 = scmp.ne.s32.totalorder %s260_s18, %s1079_s14  ;;  %p1087_p1 = scmp.lt.s32.totalorder %s260_s18, %s260_s18 }
  0x28   : > { %p1088_p4 = scmp.lt.s32.totalorder %s1079_s14, %s1079_s14 }
  0x29   : > { %p1082_p13 = pnand %p1080_p6, %p1044_p12 }
  0x2a   : > { %p1089_p5 = por %p1088_p4, %p1087_p1 }
  0x2b   : > { %p1083_p0 = pneg %p1082_p13 }
  0x2c   : > { %935 = dma.hbm_to_vmem [thread:$0]  (!%p1379_p11), %s1550_s1, 2048, %s244_s15, [#allocation6], %s1269_s22, %s1269_s22, %s1270_s23  }
  0x2d   : > { %p1090_p3 = pnand %p1089_p5, %p1083_p0 }
  0x2f   : > { %1093 = shalt.err (!%p1090_p3)
}
  0x30   : > { %s1551_s2 = sld [smem:[#allocation20_spill]]  ;;  %s1105_s15 = scalar_lea.vmem %s273_s20, 1024 }
  0x31   : > { %p1106_p10 = scmp.ne.s32.totalorder %s273_s20, %s1105_s15  ;;  %p1113_p9 = scmp.lt.s32.totalorder %s273_s20, %s273_s20 }
  0x32   : > { %p1114_p13 = scmp.lt.s32.totalorder %s1105_s15, %s1105_s15 }
  0x33   : > { %p1108_p7 = pnand %p1106_p10, %p1044_p12 }
  0x34   : > { %p1115_p8 = por %p1114_p13, %p1113_p9 }
  0x35   : > { %p1109_p6 = pneg %p1108_p7 }
  0x36   : > { %938 = dma.hbm_to_vmem [thread:$0]  (!%p1379_p11), %s1551_s2, 128, %s260_s18, [#allocation6]  }
  0x37   : > { %p1116_p1 = pnand %p1115_p8, %p1109_p6 }
  0x39   : > { %1119 = shalt.err (!%p1116_p1)
}
  0x3a   : > { %s1552_s4 = sld [smem:[#allocation21_spill]]  ;;  %s48_s18 = sadd.s32 1, %s1252_s26 }
  0x3b   : > { %s39_s8 = sadd.s32 1, %s1260_s28  ;;  %p55_p4 = scmp.ne.s32.totalorder %s1252_s26, %s1248_s25 }
  0x3c   : > { %p41_p8 = scmp.ge.s32.totalorder %s39_s8, 2  ;;  %p56_p12 = scmp.eq.s32.totalorder %s1264_s29, 0 }
  0x3d   : > { %p1416_p0 = por %p1354_p2, %p55_p4  ;;  %p953_p5 = scmp.lt.s32.totalorder %s1264_s29, 2 }
  0x3e   : > { %s1568_s8 = smov (%p41_p8, %s39_s8), 0  ;;  %p57_p3 = por %p56_p12, %p55_p4 }
  0x3f   : > { %1554 = sst [smem:[#allocation18_spill]] %s1568_s8  ;;  %s289_s14 = sand.u32 1, %s1252_s26  }
  0x40   : > { %941 = dma.hbm_to_vmem [thread:$0]  (!%p1379_p11), %s1552_s4, 1024, %s273_s20, [#allocation9], %s1269_s22, %s1269_s22, %s1270_s23  }
  0x41   : > { %s43_s17 = ssub.s32 %s1260_s28, %s1568_s8  ;;  %s816_s20 = sshll.u32 %s289_s14, 3 }
  0x42   : > { %p46_p10 = scmp.eq.s32.totalorder %s43_s17, 0  ;;  %s859_s22 = sshll.u32 %s1260_s28, 7 }
  0x43   : > { %s301_s21 = scalar_lea.hbm %s1528_s0, %s859_s22  ;;  %s293_s30 = scalar_lea.vmem [#allocation2], %s816_s20 }
  0x44   : > { %s1428_s23 = scalar_select %p46_p10, %s1252_s26, %s48_s18  }
  0x45   : > { %s303_s1 = sshll.u32 %s293_s30, 4  ;;  %p1435_p11 = pnand %p953_p5, %p57_p3  ;;  %s304_s1 = int_to_ptr.vmem [resolvable:$true] %s303_s1 }
  0x46   : > { %s290_s4 = scalar_lea.sflag [#allocation3], %s289_s14  ;;  %s1133_s17 = scalar_lea.vmem %s304_s1, 128 }
  0x47   : > { %p1122_p7 = pneg %p1435_p11  ;;  %p1134_p6 = scmp.ne.s32.totalorder %s304_s1, %s1133_s17 }
  0x48   : > { %s1271_s18 = smov [#allocation2]  }
  0x49   : > { %p1136_p9 = pnand %p1134_p6, %p1122_p7  ;;  %s1138_s8 = sshll.u32 %s1271_s18, 4  ;;  %s1139_s8 = int_to_ptr.vmem [resolvable:$false] %s1138_s8 }
  0x4a   : > { %s1140_s22 = scalar_lea.vmem %s1139_s8, 256  ;;  %p1141_p1 = scmp.lt.s32.totalorder %s304_s1, %s1139_s8 }
  0x4b   : > { %p1137_p13 = pneg %p1136_p9  ;;  %p1142_p4 = scmp.lt.s32.totalorder %s1140_s22, %s1133_s17 }
  0x4d   : > { %p1143_p8 = por %p1142_p4, %p1141_p1 }
  0x4f   : > { %p1144_p12 = pnand %p1143_p8, %p1137_p13 }
  0x51   : > { %1147 = shalt.err (!%p1144_p12)
}
  0x52   : > { %945 = dma.hbm_to_vmem [thread:$0]  (!%p1435_p11), %s301_s21, 128, %s304_s1, %s290_s4  }
  0x53   : > { %p1556_p5 = scmp.ne.s32.totalorder %s1548_s13, 0 }
  0x54   : > { %s1446_s14 = sand.u32 (!%p1556_p5), 1, %s1248_s25   ;;  %p1557_p3 = scmp.ne.s32.totalorder (!%p1556_p5), %s1546_s11, 0 }
  0x55   : > { %312 = sbr.rel (%p1556_p5) target bundleno = 398 (0x18e), region = 44  ;;  %s820_s20 = sshll.u32 (!%p1556_p5), %s1446_s14, 3 }
  0x56   : > { %s315_s19 = scalar_lea.sflag (!%p1556_p5), [#allocation3], %s1446_s14  ;;  %s318_s8 = scalar_lea.vmem (!%p1556_p5), [#allocation2], %s820_s20 }
  0x5a   : > { %1223 = dma.done.wait (%p1557_p3), %s315_s19, 128  }
  0x5b   : > { %1225 = vsyncadd (%p1557_p3), %s315_s19, 4294967168  ;;  %p1558_p10 = scmp.ne.s32.totalorder %s1544_s9, 0 }
  0x5d   : > { %1227 = dma.done.wait (%p1558_p10), [#allocation6], 2176  }
  0x5e   : > { %1229 = vsyncadd (%p1558_p10), [#allocation6], 4294965120 }
  0x5f   : > { %1231 = dma.done.wait (%p1558_p10), [#allocation9], 1024  }
  0x60   : > { %1233 = vsyncadd (%p1558_p10), [#allocation9], 4294966272  ;;  %v1016_v0 = vld [vmem:[#allocation5 + $0x78] sm:$0xff]   ;;  %v1018_v2 = vld [vmem:[#allocation5 + $0x70] sm:$0xff]   ;;  %p540_p11 = scmp.eq.s32.totalorder %s1256_s27, 1  ;;  %s1467_s1 = scalar_lea.vmem [#allocation10], %s820_s20 }
  0x61   : > { %v1017_v1 = vld [vmem:[#allocation5 + $0x38] sm:$0xff]   ;;  %861 = vmatprep.subr.bf16.mxu0 %v1016_v0  ;;  %v1019_v3 = vld [vmem:[#allocation5 + $0x30] sm:$0xff]   ;;  %v1020_v4 = vld [vmem:[#allocation5 + $0x68] sm:$0xff]   ;;  %v1272_v27 = vmov (%p540_p11), 0.0   ;;  %vm1273_vm0 = vmmov (%p540_p11), 0  }
  0x62   : > { %862 = vmatpush3.bf16.msra.mxu0 %v1017_v1  ;;  %v1021_v5 = vld [vmem:[#allocation5 + $0x28] sm:$0xff]   ;;  %v1022_v6 = vld [vmem:[#allocation5 + $0x60] sm:$0xff]   ;;  %v1024_v8 = vld [vmem:[#allocation5 + $0x58] sm:$0xff]  }
  0x63   : > { %863 = vmatprep.subr.bf16.mxu0 %v1018_v2  ;;  %v1023_v7 = vld [vmem:[#allocation5 + $0x20] sm:$0xff]   ;;  %v1025_v9 = vld [vmem:[#allocation5 + $0x18] sm:$0xff]   ;;  %v1026_v10 = vld [vmem:[#allocation5 + $0x50] sm:$0xff]  }
  0x64   : > { %v362_v11 = vld [vmem:[%s318_s8] sm:$0xff]  ;;  %v1028_v14 = vld [vmem:[#allocation5 + $0x48] sm:$0xff]   ;;  %v1030_v16 = vld [vmem:[#allocation5 + $0x40] sm:$0xff]  }
  0x65   : > { %v826_v12 = vcombine.high %v362_v11, %v362_v11  ;;  %v1027_v13 = vld [vmem:[#allocation5 + $0x10] sm:$0xff]   ;;  %v1029_v15 = vld [vmem:[#allocation5 + $0x8] sm:$0xff]   ;;  %v1031_v17 = vld [vmem:[#allocation5] sm:$0xff]   ;;  %v825_v18 = vcombine.low %v362_v11, %v362_v11 }
  0x66   : > { %864 = vmatpush3.bf16.msra.mxu0 %v1019_v3  ;;  %v395_v20 = vld [vmem:[#allocation7] sm:$0xff]  ;;  %v1035_v28 = vld [vmem:[#allocation8 + $0x30] sm:$0xff] (%p540_p11)   ;;  %v1036_v29 = vld [vmem:[#allocation8 + $0x28] sm:$0xff] (%p540_p11)  }
  0x67   : > { %865 = vmatprep.subr.bf16.mxu0 %v1020_v4  ;;  %531 = vmatprep.mubr.bf16.mxu0 %v826_v12  ;;  %v1034_v26 = vld [vmem:[#allocation8 + $0x38] sm:$0xff] (%p540_p11)   ;;  %v1037_v30 = vld [vmem:[#allocation8 + $0x20] sm:$0xff] (%p540_p11)   ;;  %v1039_v32 = vld [vmem:[#allocation8 + $0x10] sm:$0xff] (%p540_p11)  }
  0x68   : > { %v1038_v31 = vld [vmem:[#allocation8 + $0x18] sm:$0xff] (%p540_p11)   ;;  %v1040_v33 = vld [vmem:[#allocation8 + $0x8] sm:$0xff] (%p540_p11)   ;;  %v1041_v34 = vld [vmem:[#allocation8] sm:$0xff] (%p540_p11)  }
  0x69   : > { %v546_v35 = vld [vmem:[%s1531_s3] sm:$0x1] (%p540_p11) }
  0x6a   : > { %866 = vmatpush3.bf16.msra.mxu0 %v1021_v5  ;;  %v844_v36 = vld [vmem:[%s1533_s5] ss:$0 sm:$0xff] (%p540_p11) }
  0x6b   : > { %867 = vmatprep.subr.bf16.mxu0 %v1022_v6 }
  0x6e   : > { %868 = vmatpush3.bf16.msra.mxu0 %v1023_v7 }
  0x6f   : > { %869 = vmatprep.subr.bf16.mxu0 %v1024_v8 }
  0x72   : > { %870 = vmatpush3.bf16.msra.mxu0 %v1025_v9 }
  0x73   : > { %871 = vmatprep.subr.bf16.mxu0 %v1026_v10 }
  0x76   : > { %872 = vmatpush3.bf16.msra.mxu0 %v1027_v13 }
  0x77   : > { %873 = vmatprep.subr.bf16.mxu0 %v1028_v14 }
  0x7a   : > { %874 = vmatpush3.bf16.msra.mxu0 %v1029_v15 }
  0x7b   : > { %875 = vmatprep.subr.bf16.mxu0 %v1030_v16 }
  0x7e   : > { %876 = vmatpush3.bf16.msra.mxu0 %v1031_v17 }
  0x7f   : > { %892 = vmatprep.subr.bf16.mxu0 (%p540_p11), %v1272_v27 }
  0x81   : > { %532 = vmatmul.mubr.bf16.vlgmr.msra.gmra.mxu0 %v825_v18 }
  0x82   : > { %893 = vmatpush3.bf16.msra.mxu0 (%p540_p11), %v1034_v26  ;;  %908 = vmatprep.mubr.msk.bf16.mxu0 (%p540_p11), %vm1273_vm0, %v1272_v27 }
  0x83   : > { %894 = vmatprep.subr.bf16.mxu0 (%p540_p11), %v1272_v27 }
  0x86   : > { %895 = vmatpush3.bf16.msra.mxu0 (%p540_p11), %v1035_v28 }
  0x87   : > { %896 = vmatprep.subr.bf16.mxu0 (%p540_p11), %v1272_v27 }
  0x8a   : > { %897 = vmatpush3.bf16.msra.mxu0 (%p540_p11), %v1036_v29 }
  0x8b   : > { %898 = vmatprep.subr.bf16.mxu0 (%p540_p11), %v1272_v27 }
  0x8e   : > { %899 = vmatpush3.bf16.msra.mxu0 (%p540_p11), %v1037_v30 }
  0x8f   : > { %900 = vmatprep.subr.bf16.mxu0 (%p540_p11), %v1272_v27 }
  0x92   : > { %901 = vmatpush3.bf16.msra.mxu0 (%p540_p11), %v1038_v31 }
  0x93   : > { %902 = vmatprep.subr.bf16.mxu0 (%p540_p11), %v1272_v27 }
  0x96   : > { %903 = vmatpush3.bf16.msra.mxu0 (%p540_p11), %v1039_v32 }
  0x97   : > { %904 = vmatprep.subr.bf16.mxu0 (%p540_p11), %v1272_v27 }
  0x9a   : > { %905 = vmatpush3.bf16.msra.mxu0 (%p540_p11), %v1040_v33 }
  0x9b   : > { %906 = vmatprep.subr.bf16.mxu0 (%p540_p11), %v1272_v27 }
  0x9e   : > { %907 = vmatpush3.bf16.msra.mxu0 (%p540_p11), %v1041_v34 }
  0xa1   : > { %909 = vmatmul.mubr.bf16.vlgmr.msra.gmra.mxu0 (%p540_p11), %v546_v35 }
 0x141   : > { %v877_v19 = vpop.f32.mrf.mxu0 }
 0x143   : > { %v878_v21 = vpop.f32.mrf.mxu0 }
 0x144   : > { %v879_v22 = vadd.f32 %v878_v21, %v877_v19  ;;  %545 = sbr.rel (!%p540_p11) target bundleno = 360 (0x168), region = 64 }
 0x145   : > { %v880_v23 = vpop.f32.mrf.mxu0 }
 0x146   : > { %v534_v24 = vadd.f32 %v879_v22, %v395_v20 }
 0x147   : > { %v881_v25 = vpop.f32.mrf.mxu0 }
 0x148   : > { %539 = vst [vmem:[%s1467_s1] sm:$0xff] %v534_v24 }
 0x161   : > { %v652_v37 = vpop.f32.mrf.mxu0 }
 0x162   : > { %v653_v38 = vadd.f32 %v844_v36, %v652_v37 }
 0x163   : > { %v910_v39 = vpop.f32.mrf.mxu0 }
 0x164   : > { %658 = vst [vmem:[#allocation11] sm:$0x3] %v653_v38 }
 0x165   : > { %v655_v40 = vpop.f32.mrf.mxu0 }
 0x167   : > { %v911_v41 = vpop.f32.mrf.mxu0 }
 0x168 PF: > { %s854_s13 = sshll.u32 %s1256_s27, 7  ;;  %s674_s17 = sshll.u32 %s1467_s1, 4  ;;  %s675_s17 = int_to_ptr.vmem [resolvable:$true] %s674_s17 }
 0x169   : > { %s672_s30 = scalar_lea.hbm %s1534_s6, %s854_s13  ;;  %s660_s18 = scalar_lea.sflag [#allocation4], %s1446_s14 }
 0x16a   : > { %s1148_s22 = scalar_lea.vmem %s675_s17, 128  ;;  %s1274_s20 = smov [#allocation10]  }
 0x16b   : > { %p1149_p7 = scmp.ne.s32.totalorder %s675_s17, %s1148_s22  ;;  %s1152_s19 = sshll.u32 %s1274_s20, 4  ;;  %s1153_s19 = int_to_ptr.vmem [resolvable:$false] %s1152_s19 }
 0x16c   : > { %s1154_s8 = scalar_lea.vmem %s1153_s19, 256  ;;  %p1155_p13 = scmp.lt.s32.totalorder %s675_s17, %s1153_s19 }
 0x16d   : > { %p1150_p6 = pnand %p1149_p7, %p1416_p0  ;;  %p1156_p1 = scmp.lt.s32.totalorder %s1154_s8, %s1148_s22 }
 0x16f   : > { %p1151_p9 = pneg %p1150_p6  ;;  %p1157_p4 = por %p1156_p1, %p1155_p13 }
 0x171   : > { %p1158_p8 = pnand %p1157_p4, %p1151_p9 }
 0x173   : > { %1161 = shalt.err (!%p1158_p8)
}
 0x174   : > { %s1162_s27 = scalar_lea.hbm %s672_s30, 128  ;;  %s1166_s2 = scalar_lea.hbm %s1534_s6, 256 }
 0x175   : > { %p1163_p12 = scmp.ne.s32.totalorder %s672_s30, %s1162_s27  ;;  %p1167_p10 = scmp.lt.s32.totalorder %s672_s30, %s1534_s6 }
 0x176   : > { %p1168_p11 = scmp.lt.s32.totalorder %s1166_s2, %s1162_s27 }
 0x177   : > { %p1164_p5 = pnand %p1163_p12, %p1416_p0 }
 0x178   : > { %p1169_p7 = por %p1168_p11, %p1167_p10 }
 0x179   : > { %p1165_p3 = pneg %p1164_p5 }
 0x17b   : > { %p1170_p6 = pnand %p1169_p7, %p1165_p3 }
 0x17d   : > { %1173 = shalt.err (!%p1170_p6)
}
 0x17e   : > { %926 = dma.vmem_to_hbm [thread:$0]  (%p1416_p0), %s675_s17, 128, %s672_s30, %s660_s18  }
 0x17f   : > { %s1275_s11 = smov [#allocation11]  }
 0x180   : > { %s685_s13 = sshll.u32 %s1275_s11, 4  ;;  %s686_s13 = int_to_ptr.vmem [resolvable:$true] %s685_s13 }
 0x181   : > { %s1174_s15 = scalar_lea.vmem %s686_s13, 32  ;;  %p1181_p4 = scmp.lt.s32.totalorder %s686_s13, %s686_s13 }
 0x182   : > { %p1175_p9 = scmp.ne.s32.totalorder %s686_s13, %s1174_s15  ;;  %p1182_p8 = scmp.lt.s32.totalorder %s1174_s15, %s1174_s15 }
 0x184   : > { %p1176_p13 = pnand %p1175_p9, %p1354_p2  ;;  %p1183_p12 = por %p1182_p8, %p1181_p4 }
 0x186   : > { %p1177_p1 = pneg %p1176_p13 }
 0x188   : > { %p1184_p5 = pnand %p1183_p12, %p1177_p1 }
 0x18a   : > { %1187 = shalt.err (!%p1184_p5)
}
 0x18b   : > { %928 = dma.vmem_to_hbm [thread:$0]  (%p1354_p2), %s686_s13, 32, %s1535_s7, [#allocation12]  }
 0x18c   : > { %1235 = dma.done.wait (%p1354_p2), [#allocation12], 32  }
 0x18d   : > { %1237 = vsyncadd (%p1354_p2), [#allocation12], 4294967264 }
 0x18e PF: > { %s701_s16 = sand.u32 1, %s1244_s24   ;;  %p1559_p0 = scmp.ne.s32.totalorder %s1547_s12, 0 }
 0x18f   : > { %p1560_p3 = scmp.ge.s32.totalorder %s1264_s29, 2  ;;  %s702_s30 = scalar_lea.sflag [#allocation4], %s701_s16 }
 0x191   : > { %p947_p10 = pnand %p1560_p3, %p1559_p0 }
 0x193   : > { %p948_p11 = pneg %p947_p10 }
 0x195   : > { %1239 = dma.done.wait (%p948_p11), %s702_s30, 128  }
 0x196   : > { %1241 = vsyncadd (%p948_p11), %s702_s30, 4294967168  ;;  %s27_s29 = sadd.s32 1, %s1264_s29   ;;  %s1561_s10 = sld [smem:[#allocation18_spill]] }
 0x197   : > { %p24_p7 = scmp.ge.s32.totalorder %s27_s29, 4   ;;  %s1562_s24 = smov %s1248_s25 }
 0x198   : > { %s1563_s25 = smov %s1252_s26  ;;  %s1564_s26 = smov %s1428_s23 }
 0x199   : > { %s1565_s27 = smov %s1260_s28  ;;  %26 = sbr.rel (!%p24_p7) target bundleno = 13 (0xd), region = 114 }
 0x19c   : > { %s1566_s28 = smov %s1561_s10 }
 0x19e   :  { %707 = vsyncpa [#allocation3], 1 }
 0x19f   :  { %709 = vsyncpa [#allocation3 + $0x1], 1 }
 0x1a0   :  { %710 = vsyncpa [#allocation6], 1 }
 0x1a1   :  { %711 = vsyncpa [#allocation9], 1 }
 0x1a2   :  { %712 = vsyncpa [#allocation4], 1 }
 0x1a3   :  { %714 = vsyncpa [#allocation4 + $0x1], 1 }
 0x1a4   :  { %715 = vsyncpa [#allocation12], 1 }

</bundles_post_ra>
